<compile_context>
chip_gen: v7x
topology: tpu7x:2x2x1
jax: 0.10.0
libtpu: 0.0.40
codegen_flags: <defaults>
</compile_context>

<pallas_src>
import math
import re
import functools

import jax
import jax.numpy as jnp
from jax.experimental import pallas as pl
from jax.experimental.pallas import tpu as pltpu


# ----------------------------------------------------------------------------
# pe table (built once, in the model dtype -- hoisted out of the forward).
# ----------------------------------------------------------------------------

def make_positional_table(d_model: int, max_len: int = 5000, dtype=jnp.float32):
    """Same values as PositionalEncoding.__init__, returned as (max_len, d_model)."""
    position = jnp.arange(0, max_len, dtype=jnp.float32)[:, None]            # (max_len, 1)
    div_term = jnp.exp(
        jnp.arange(0, d_model, 2, dtype=jnp.float32) * (-math.log(10000.0) / d_model)
    )                                                                        # (d_model/2,)
    pe = jnp.zeros((max_len, d_model), dtype=jnp.float32)
    pe = pe.at[:, 0::2].set(jnp.sin(position * div_term))
    pe = pe.at[:, 1::2].set(jnp.cos(position * div_term))
    return pe.astype(dtype)


def _tpu_generation():
    """Best-effort TPU generation (5 / 6 / 7 / ...), None if it can't be parsed."""
    try:
        kind = jax.devices()[0].device_kind.lower()
    except Exception:
        return None
    m = re.search(r"(\d+)", kind)
    return int(m.group(1)) if m else None


# ----------------------------------------------------------------------------
# Kernels.
#   folded   (b_fold >= 1): x/out tiles are (TS, B*D); pe tile is (TS, D) when
#                           b_fold > 1 (lane-aligned in-kernel repeat) or
#                           (TS, B*D) when b_fold == 1 (pre-tiled).
#   unfolded (b_fold == 0): x/out tiles are (TS, B, D); pe tile is (TS, 1, D)
#                           and broadcasts over the batch (sublane) axis.
# ----------------------------------------------------------------------------

def _bcast_pe(pe, b_fold):
    if b_fold > 1:
        # Lane-aligned (D % 128 == 0) repeat of the pe row across the folded B.
        return jnp.concatenate([pe] * b_fold, axis=-1)
    return pe


def _pe_add_kernel(x_ref, pe_ref, o_ref, *, b_fold):
    # Eval mode / p == 0: plain add.
    o_ref[...] = x_ref[...] + _bcast_pe(pe_ref[...], b_fold)


def _pe_add_dropout_hw_kernel(seed_ref, x_ref, pe_ref, o_ref, *, p, b_fold):
    # Training mode on TPU: inverted dropout with the on-chip PRNG.
    y = x_ref[...] + _bcast_pe(pe_ref[...], b_fold)
    # Mix the call seed with the tile index so neighbouring tiles / calls never
    # share a stream.
    pltpu.prng_seed(seed_ref[0], pl.program_id(0))
    bits = pltpu.bitcast(pltpu.prng_random_bits(y.shape), jnp.int32)
    bits = bits & jnp.int32(0x7FFFFFFF)                       # uniform over [0, 2^31)
    thresh = jnp.int32(min(int(round(p * (1 << 31))), (1 << 31) - 1))
    keep = bits >= thresh                                     # P(keep) = 1 - p
    scale = jnp.asarray(1.0 / (1.0 - p), dtype=y.dtype)
    # Scale folded into the select: one select + one mul per element.
    o_ref[...] = y * jnp.where(keep, scale, jnp.zeros_like(scale))


def _pe_add_dropout_mask_kernel(x_ref, pe_ref, m_ref, o_ref, *, b_fold):
    # Portable fallback (interpret / non-TPU): pre-scaled keep multiplier from host.
    o_ref[...] = (x_ref[...] + _bcast_pe(pe_ref[...], b_fold)) * m_ref[...]


# ----------------------------------------------------------------------------
# Wrapper
# ----------------------------------------------------------------------------

def positional_encoding_forward(x, pe_table, *, p: float = 0.1, training: bool = True,
                                seed: int = 0):
    """x: (S, B, D); pe_table: (S, D) (preferred, pre-sliced/pre-cast) or
    (max_len, D) / (max_len, 1, D).  Returns (S, B, D) = dropout(x + pe[:S])."""
    assert 0.0 <= p < 1.0
    S, B, D = x.shape
    itemsize = jnp.dtype(x.dtype).itemsize
    apply_dropout = training and p > 0.0

    # pe: expected pre-sliced to S and already in x.dtype (hoist in callers);
    # the branches below are cheap fallbacks for ad-hoc callers only.
    pe_s = pe_table if pe_table.shape[0] == S else pe_table[:S]
    if pe_s.ndim == 3:                      # accept the torch-style (S, 1, D) buffer
        pe_s = pe_s.reshape(S, D)
    if pe_s.dtype != x.dtype:
        pe_s = pe_s.astype(x.dtype)

    # ---- layout: fold B into the lane axis when the (B, D) tile is sparse ------
    # In the (TS, B, D) layout B maps to sublanes and D to lanes; small B / D
    # wastes most of every vreg and forces masked stores.
    sub_pack = 8 * max(1, 4 // itemsize)           # rows per vreg: 8 f32 / 16 bf16
    fold = (D % 128 != 0) or (B < sub_pack)
    if fold:
        x_in = x.reshape(S, B * D)                 # free for row-major (S, B, D)
        if B > 1 and D % 128 == 0:
            # Lane-aligned: broadcast pe across B inside the kernel; pe HBM
            # stream stays 1/B the size of x.
            b_fold, pe_in = B, pe_s                                  # (S, D)
        else:
            # Lane-unaligned (e.g. D < 128): pre-tile pe so the kernel is a plain
            # dense 2-D op with no in-kernel lane shuffles.
            # TODO(synk): callers should cache this tiled table per (S, B, D, dtype).
            b_fold = 1
            pe_in = jnp.tile(pe_s, (1, B)) if B > 1 else pe_s        # (S, B*D)
    else:
        b_fold, x_in, pe_in = 0, x, pe_s.reshape(S, 1, D)

    # ---- generation-aware tiling of the sequence axis ---------------------------
    gen = _tpu_generation()
    if gen is not None and gen < 7:
        vmem_limit = 64 * 1024 * 1024              # 128 MiB physical VMEM (v5e/v6e)
    else:
        vmem_limit = 32 * 1024 * 1024              # 64 MiB physical VMEM (v7x / unknown)

    row_x = B * D * itemsize                       # one sequence row of x (== out)
    row_pe = pe_in.shape[-1] * itemsize
    per_row = 2 * row_x + 2 * row_x + 2 * row_pe   # x, out, pe: double-buffered streams
    if apply_dropout:
        per_row += 3 * B * D * 4                   # f32/i32 temporaries (y, bits, keep)
    budget = int(0.75 * vmem_limit)                # leave Mosaic headroom
    TS = max(1, min(S, budget // max(per_row, 1)))
    TS = max(1, min(TS, (8 * 1024 * 1024) // max(row_x, 1)))   # DMA-amortization plateau
    if gen is None or gen >= 7:
        TS = min(TS, pl.cdiv(S, 2))                # >=2 tiles so both v7x TCs get work
    if TS < S:                                     # keep tiles sublane-aligned
        TS = min(S, max(sub_pack, (TS // sub_pack) * sub_pack))
    grid = (pl.cdiv(S, TS),)

    if fold:
        x_block, pe_block = (TS, B * D), (TS, pe_in.shape[-1])
        x_map = lambda i: (i, 0)
        x_map_p = lambda i, seed_ref: (i, 0)
    else:
        x_block, pe_block = (TS, B, D), (TS, 1, D)
        x_map = lambda i: (i, 0, 0)
        x_map_p = lambda i, seed_ref: (i, 0, 0)

    out_shape = jax.ShapeDtypeStruct(x_in.shape, x.dtype)
    compiler_params = pltpu.CompilerParams(
        dimension_semantics=("parallel",),         # independent tiles -> 2 TCs on v7x
        vmem_limit_bytes=vmem_limit,
    )

    if not apply_dropout:
        out = pl.pallas_call(
            functools.partial(_pe_add_kernel, b_fold=b_fold),
            out_shape=out_shape,
            grid=grid,
            in_specs=[pl.BlockSpec(x_block, x_map), pl.BlockSpec(pe_block, x_map)],
            out_specs=pl.BlockSpec(x_block, x_map),
            compiler_params=compiler_params,
        )(x_in, pe_in)
        return out.reshape(S, B, D)

    if jax.default_backend() == "tpu":
        # Fast path: dropout mask generated in-kernel with the TPU hardware PRNG.
        # TODO(synk): deterministic per (seed, tiling) but not bit-identical to torch's RNG.
        seed_arr = jnp.asarray([seed], dtype=jnp.int32)
        out = pl.pallas_call(
            functools.partial(_pe_add_dropout_hw_kernel, p=float(p), b_fold=b_fold),
            out_shape=out_shape,
            grid_spec=pltpu.PrefetchScalarGridSpec(
                num_scalar_prefetch=1,                          # seed lives in SMEM
                grid=grid,
                in_specs=[pl.BlockSpec(x_block, x_map_p),
                          pl.BlockSpec(pe_block, x_map_p)],
                out_specs=pl.BlockSpec(x_block, x_map_p),
            ),
            compiler_params=compiler_params,
        )(seed_arr, x_in, pe_in)
        return out.reshape(S, B, D)

    # Portable fallback: the TPU PRNG primitives have no CPU/interpret lowering,
    # so generate the pre-scaled keep multiplier on the host and stream it in.
    key = jax.random.fold_in(jax.random.PRNGKey(0), seed)
    keep = jax.random.bernoulli(key, 1.0 - p, x_in.shape)
    mult = keep.astype(x.dtype) * jnp.asarray(1.0 / (1.0 - p), x.dtype)
    out = pl.pallas_call(
        functools.partial(_pe_add_dropout_mask_kernel, b_fold=b_fold),
        out_shape=out_shape,
        grid=grid,
        in_specs=[pl.BlockSpec(x_block, x_map),
                  pl.BlockSpec(pe_block, x_map),
                  pl.BlockSpec(x_block, x_map)],
        out_specs=pl.BlockSpec(x_block, x_map),
        compiler_params=compiler_params,
    )(x_in, pe_in, mult)
    return out.reshape(S, B, D)


if __name__ == "__main__":
    key = jax.random.PRNGKey(0)
    p = 0.1
    # Exercise all three layout paths:
    #   (8, 2, 32)   fold, lane-unaligned -> pre-tiled pe
    #   (8, 2, 128)  fold, lane-aligned   -> in-kernel pe broadcast across B
    #   (16, 8, 128) dense, unfolded (real-BERT-like) layout
    for S, B, D in [(8, 2, 32), (8, 2, 128), (16, 8, 128)]:
        key, sub = jax.random.split(key)
        x = jax.random.normal(sub, (S, B, D), dtype=jnp.float32)

        # Table built once in the model dtype and pre-sliced to the static seq
        # length, so the forward does no per-call slice/convert work.
        pe_s = make_positional_table(D, max_len=5000, dtype=x.dtype)[:S]

        # Eval mode (dropout identity) -> exact check against pure-JAX reference.
        out_eval = positional_encoding_forward(x, pe_s, p=p, training=False)
        jax.block_until_ready(out_eval)
        ref = x + pe_s[:, None, :]
        assert out_eval.shape == (S, B, D)
        assert jnp.allclose(out_eval, ref, atol=1e-6, rtol=1e-6)

        # Training mode: every element is either dropped (0) or scaled by 1/(1-p).
        out_train = positional_encoding_forward(x, pe_s, p=p, training=True, seed=0)
        jax.block_until_ready(out_train)
        assert out_train.shape == (S, B, D)
        scaled = ref / (1.0 - p)
        ok = jnp.logical_or(
            jnp.isclose(out_train, 0.0, atol=1e-6),
            jnp.isclose(out_train, scaled, atol=1e-5, rtol=1e-5),
        )
        assert bool(jnp.all(ok))

    print("KERNEL_OK")
</pallas_src>

<mosaic_0001>
module attributes {stable_mosaic.version = 11 : i64} {
  func.func @_pe_add_kernel(%arg0: i32, %arg1: memref<8x64xf32, #tpu.memory_space<vmem>>, %arg2: memref<8x64xf32, #tpu.memory_space<vmem>>, %arg3: memref<8x64xf32, #tpu.memory_space<vmem>>) attributes {dimension_semantics = [#tpu.dimension_semantics<parallel>], iteration_bounds = array<i64: 1>, scalar_prefetch = 0 : i64, scratch_operands = 0 : i64, tpu.core_type = #tpu.core_type<tc>, window_params = [{transform_indices = @transform_0, window_bounds = array<i64: 8, 64>}, {transform_indices = @transform_1, window_bounds = array<i64: 8, 64>}, {transform_indices = @transform_2, window_bounds = array<i64: 8, 64>}]} {
    %c0 = arith.constant 0 : index
    %c0_0 = arith.constant 0 : index
    %0 = vector.load %arg1[%c0, %c0_0] : memref<8x64xf32, #tpu.memory_space<vmem>>, vector<8x64xf32>
    %c0_1 = arith.constant 0 : index
    %c0_2 = arith.constant 0 : index
    %1 = vector.load %arg2[%c0_1, %c0_2] : memref<8x64xf32, #tpu.memory_space<vmem>>, vector<8x64xf32>
    %2 = arith.addf %0, %1 : vector<8x64xf32>
    %c0_3 = arith.constant 0 : index
    %c0_4 = arith.constant 0 : index
    %3 = vector.load %arg3[%c0_3, %c0_4] : memref<8x64xf32, #tpu.memory_space<vmem>>, vector<8x64xf32>
    tpu.vector_store %arg3[%c0_3, %c0_4], %2 {strides = array<i32>} : memref<8x64xf32, #tpu.memory_space<vmem>>, vector<8x64xf32>,
    return
  }
  func.func @transform_0(%arg0: i32) -> (i32, i32) {
    %c0_i32 = arith.constant 0 : i32
    %c0_i32_0 = arith.constant 0 : i32
    return %arg0, %c0_i32 : i32, i32
  }
  func.func @transform_1(%arg0: i32) -> (i32, i32) {
    %c0_i32 = arith.constant 0 : i32
    %c0_i32_0 = arith.constant 0 : i32
    return %arg0, %c0_i32 : i32, i32
  }
  func.func @transform_2(%arg0: i32) -> (i32, i32) {
    %c0_i32 = arith.constant 0 : i32
    %c0_i32_0 = arith.constant 0 : i32
    return %arg0, %c0_i32 : i32, i32
  }
}

</mosaic_0001>

<bundles_post_ra>
// kernel: tpu_custom_call.1
= control target key start
LH: loop header
LB: loop body
LE: loop exit
PB: predicated region body
PF: predicated region fallthrough
CT: control target
= control target key end

     0   :  { %7 = vsyncpa [#allocation3], 0  ;;  %s186_s0 = inlined_call_operand.hbm [shape: f32[8,64], index: 0, kind: input, shape index: {}]   ;;  %s187_s1 = inlined_call_operand.hbm [shape: f32[8,64], index: 1, kind: input, shape index: {}]   ;;  %s188_s2 = inlined_call_operand.hbm [shape: f32[8,64], index: 2, kind: output, shape index: {}]  }
   0x1   :  { %8 = vsyncpa [#allocation6], 0 }
   0x2   :  { %9 = vsyncpa [#allocation4], 0  ;;  %s132_s9 = smov [#allocation2]   ;;  %s133_s11 = smov [#allocation5]  }
   0x3   :  { %s16_s10 = sshll.u32 %s132_s9, 4  ;;  %s26_s12 = sshll.u32 %s133_s11, 4  ;;  %s17_s10 = int_to_ptr.vmem [resolvable:$true] %s16_s10  ;;  %s27_s12 = int_to_ptr.vmem [resolvable:$true] %s26_s12 }
   0x4   :  { %s60_s15 = scalar_lea.hbm %s186_s0, 128 }
   0x5   :  { %p61_p0 = scmp.ne.s32.totalorder %s186_s0, %s60_s15  ;;  %p64_p1 = scmp.lt.u32.totalorder %s60_s15, %s186_s0 }
   0x7   :  { %p66_p2 = pnand %p64_p1, %p61_p0 }
   0x9   :  { %69 = shalt.err (!%p66_p2)
}
   0xa   :  { %s70_s20 = scalar_lea.vmem %s17_s10, 128  ;;  %p75_p4 = scmp.lt.s32.totalorder %s17_s10, %s17_s10 }
   0xb   :  { %p71_p3 = scmp.ne.s32.totalorder %s17_s10, %s70_s20  ;;  %p76_p5 = scmp.lt.s32.totalorder %s70_s20, %s70_s20 }
   0xd   :  { %p77_p6 = por %p76_p5, %p75_p4 }
   0xf   :  { %p78_p7 = pnand %p77_p6, %p71_p3 }
  0x11   :  { %81 = shalt.err (!%p78_p7)
}
  0x12   :  { %19 = dma.hbm_to_vmem [thread:$0]  %s186_s0, 128, %s17_s10, [#allocation3]  }
  0x13   :  { %s82_s25 = scalar_lea.hbm %s187_s1, 128 }
  0x14   :  { %p83_p8 = scmp.ne.s32.totalorder %s187_s1, %s82_s25  ;;  %p86_p9 = scmp.lt.u32.totalorder %s82_s25, %s187_s1 }
  0x16   :  { %p88_p10 = pnand %p86_p9, %p83_p8 }
  0x18   :  { %91 = shalt.err (!%p88_p10)
}
  0x19   :  { %s92_s30 = scalar_lea.vmem %s27_s12, 128  ;;  %p97_p12 = scmp.lt.s32.totalorder %s27_s12, %s27_s12 }
  0x1a   :  { %p93_p11 = scmp.ne.s32.totalorder %s27_s12, %s92_s30  ;;  %p98_p13 = scmp.lt.s32.totalorder %s92_s30, %s92_s30 }
  0x1c   :  { %p99_p0 = por %p98_p13, %p97_p12 }
  0x1e   :  { %p100_p1 = pnand %p99_p0, %p93_p11 }
  0x20   :  { %103 = shalt.err (!%p100_p1)
}
  0x21   :  { %29 = dma.hbm_to_vmem [thread:$0]  %s187_s1, 128, %s27_s12, [#allocation6]  }
  0x22   :  { %126 = dma.done.wait [#allocation3], 128  }
  0x23   :  { %127 = vsyncadd [#allocation3], 4294967168 }
  0x24   :  { %128 = dma.done.wait [#allocation6], 128  }
  0x25   :  { %129 = vsyncadd [#allocation6], 4294967168  ;;  %s134_s4 = smov [#allocation7]   ;;  %v36_v0 = vld [vmem:[#allocation2] sm:$0xff]  ;;  %v37_v1 = vld [vmem:[#allocation5] sm:$0xff]  ;;  %vm39_vm0 = vcmask 523264  }
  0x26   :  { %s47_s5 = sshll.u32 %s134_s4, 4  ;;  %v38_v2 = vadd.f32 %v37_v1, %v36_v0  ;;  %s48_s5 = int_to_ptr.vmem [resolvable:$true] %s47_s5 }
  0x27   :  { %s104_s6 = scalar_lea.vmem %s48_s5, 128  ;;  %p109_p3 = scmp.lt.s32.totalorder %s48_s5, %s48_s5 }
  0x28   :  { %40 = vst.msk [vmem:[#allocation7] sm:$0xff] %vm39_vm0, %v38_v2  ;;  %p105_p2 = scmp.ne.s32.totalorder %s48_s5, %s104_s6  ;;  %p110_p4 = scmp.lt.s32.totalorder %s104_s6, %s104_s6 }
  0x2a   :  { %p111_p5 = por %p110_p4, %p109_p3 }
  0x2c   :  { %p112_p6 = pnand %p111_p5, %p105_p2 }
  0x2e   :  { %115 = shalt.err (!%p112_p6)
}
  0x2f   :  { %s116_s8 = scalar_lea.hbm %s188_s2, 128 }
  0x30   :  { %p117_p7 = scmp.ne.s32.totalorder %s188_s2, %s116_s8  ;;  %p120_p8 = scmp.lt.u32.totalorder %s116_s8, %s188_s2 }
  0x32   :  { %p122_p9 = pnand %p120_p8, %p117_p7 }
  0x34   :  { %125 = shalt.err (!%p122_p9)
}
  0x35   :  { %50 = dma.vmem_to_hbm [thread:$0]  %s48_s5, 128, %s188_s2, [#allocation4]  }
  0x36   :  { %130 = dma.done.wait [#allocation4], 128  }
  0x37   :  { %131 = vsyncadd [#allocation4], 4294967168 }
  0x38   :  { %54 = vsyncpa [#allocation3], 1 }
  0x39   :  { %55 = vsyncpa [#allocation6], 1 }
  0x3a   :  { %56 = vsyncpa [#allocation4], 1 }

</bundles_post_ra>
